<compile_context>
chip_gen: v5e
topology: v5e:2x2
jax: 0.10.0
libtpu: 0.0.40
codegen_flags: <defaults>
</compile_context>

<pallas_src>
import functools
import math

import jax
import jax.numpy as jnp
from jax.experimental import pallas as pl
from jax.experimental.pallas import tpu as pltpu


def _lambdarank_kernel(x_ref, w1_ref, b1_ref, w2_ref, b2_ref, w3_ref, b3_ref,
                       o_ref, *, sigma):
    # Cast the streamed f32 tile to the (possibly bf16) weight dtype right at
    # the MXU; accumulation stays f32 via preferred_element_type.
    x = x_ref[...].astype(w1_ref.dtype)
    # hidden layer 1: relu(x @ W1 + b1)        (TILE_N, D0) @ (D0, H1)
    h = jnp.dot(x, w1_ref[...], preferred_element_type=jnp.float32)
    h = jnp.maximum(h + b1_ref[...], 0.0)
    # hidden layer 2: relu(h @ W2 + b2)        (TILE_N, H1) @ (H1, H2)
    h = jnp.dot(h.astype(w2_ref.dtype), w2_ref[...],
                preferred_element_type=jnp.float32)
    h = jnp.maximum(h + b2_ref[...], 0.0)
    # score head: relu6(w3 . h_row + b3) * sigma, computed as
    #   (1, H2) x (TILE_N, H2)^T -> (1, TILE_N)
    # so the result comes off the MXU already lane-dense and the store below
    # is dense instead of one masked store per 8 rows.  Kept in f32 (tiny).
    s = jax.lax.dot_general(
        w3_ref[...], h,
        dimension_numbers=(((1,), (1,)), ((), ())),
        preferred_element_type=jnp.float32)
    s = jnp.clip(s + b3_ref[...], 0.0, 6.0) * sigma
    o_ref[0] = s.astype(o_ref.dtype)


def _round_up(v, m):
    return ((v + m - 1) // m) * m


def lambdarank_forward(x, params, sigma=1.0, *, tile_n=8192,
                       mxu_dtype=jnp.bfloat16):
    """x: (N, D0).  params: [(W1,b1),(W2,b2),(w3,b3)] as produced by init_params.

    mxu_dtype: dtype used *on the MXU* for the two hidden-layer matmuls
    (weights are pre-cast once; activations are cast in-kernel).  None keeps
    everything in f32.  HBM streaming of x is always in x.dtype.
    """
    (w1, b1), (w2, b2), (w3, b3) = params
    n, d0 = x.shape
    h1 = w1.shape[1]
    h2 = w2.shape[1]

    if mxu_dtype is not None:
        # Weights are tiny and VMEM-resident; this cast is ~free and governs
        # the in-kernel activation cast (kernel uses w_ref.dtype).
        w1 = w1.astype(mxu_dtype)
        w2 = w2.astype(mxu_dtype)

    # Row tile: multiple of 128 (lane-dense score row / sublane alignment),
    # big enough to amortize per-grid-step overhead, but capped so the grid
    # has >=2 tiles whenever N allows it (keeps both v7x TCs busy).
    tile_n = max(128, (int(tile_n) // 128) * 128)
    tile_n = min(tile_n, max(128, (pl.cdiv(n, 2) // 128) * 128))
    num_tiles = pl.cdiv(n, tile_n)

    # VMEM budget (lane-padded): x block pads D0 -> 128 lanes, x2 double
    # buffering; plus f32/bf16 hidden intermediates.  Cap at 64 MiB (v7x
    # physical VMEM per TC); v5e/v6e have 128 MiB so this is conservative.
    itm = jnp.dtype(x.dtype).itemsize
    mxu_itm = jnp.dtype(mxu_dtype).itemsize if mxu_dtype is not None else itm
    sub_n = _round_up(tile_n, 8)
    vmem_est = (
        2 * sub_n * _round_up(d0, 128) * itm                     # x block (dbl-buffered)
        + 2 * 8 * _round_up(tile_n, 128) * 4                     # out block (dbl-buffered)
        + sub_n * (_round_up(d0, 128) + _round_up(h1, 128)) * mxu_itm  # casted copies
        + sub_n * (_round_up(h1, 128) + _round_up(h2, 128)) * 4  # f32 activations
        + (1 << 20))                                             # weights + slack
    vmem_limit = int(min(64 << 20, max(32 << 20, int(vmem_est * 1.5))))

    x_bytes = n * d0 * itm
    w_bytes = sum(int(a.size) * jnp.dtype(a.dtype).itemsize
                  for a in (w1, b1, w2, b2, w3, b3))
    cost = pl.CostEstimate(
        flops=2 * n * (d0 * h1 + h1 * h2 + h2),
        transcendentals=0,
        bytes_accessed=int(x_bytes + num_tiles * tile_n * 4 + w_bytes))

    kernel = functools.partial(_lambdarank_kernel, sigma=float(sigma))
    const2 = lambda i: (0, 0)     # weights/biases: DMA'd once, VMEM-resident

    # TODO(synk): optionally sweep pipeline_mode=pl.Buffered(3) on the x spec
    # on v7x once tile_n is large; default double-buffering is used here.
    out3d = pl.pallas_call(
        kernel,
        out_shape=jax.ShapeDtypeStruct((num_tiles, 1, tile_n), jnp.float32),
        grid=(num_tiles,),
        in_specs=[
            # x tile (streamed); ragged last block handled by Pallas edge
            # logic -- no wrapper-side jnp.pad HBM pass.
            pl.BlockSpec((tile_n, d0), lambda i: (i, 0)),
            pl.BlockSpec((d0, h1), const2),                 # W1 (in, out)
            pl.BlockSpec((1, h1), const2),                  # b1
            pl.BlockSpec((h1, h2), const2),                 # W2 (in, out)
            pl.BlockSpec((1, h2), const2),                  # b2
            pl.BlockSpec((1, h2), const2),                  # w3 (torch (1, in))
            pl.BlockSpec((1, 1), const2),                   # b3
        ],
        out_specs=pl.BlockSpec((1, 1, tile_n), lambda i: (i, 0, 0)),
        compiler_params=pltpu.CompilerParams(
            dimension_semantics=("parallel",),
            vmem_limit_bytes=vmem_limit),
        cost_estimate=cost,
    )(x, w1, b1, w2, b2, w3, b3)

    # lane-dense (num_tiles, 1, TILE_N) slab -> (N, 1) scores.  Rows past N
    # (the ragged-tail block padding) are strictly per-row garbage and are
    # dropped here; nothing in the kernel reduces across rows.
    return out3d.reshape(num_tiles * tile_n, 1)[:n]


def init_params(key, net_structures):
    """Mimics nn.Linear default init: U(-1/sqrt(fan_in), +1/sqrt(fan_in)).

    Hidden-layer weights are stored (in, out) (transposed from torch's
    (out, in)) so the kernel does plain x @ W.  The final 1-output head weight
    stays in torch orientation (1, in) because the kernel contracts it against
    h's last dim directly.
    """
    dims = list(net_structures)
    params = []
    for i in range(len(dims) - 1):
        fan_in, fan_out = dims[i], dims[i + 1]
        key, kw, kb = jax.random.split(key, 3)
        bound = 1.0 / math.sqrt(fan_in)
        w = jax.random.uniform(kw, (fan_in, fan_out), jnp.float32, -bound, bound)
        b = jax.random.uniform(kb, (1, fan_out), jnp.float32, -bound, bound)
        params.append((w, b))
    # final head: Linear(net_structures[-1], 1)
    fan_in = dims[-1]
    key, kw, kb = jax.random.split(key, 3)
    bound = 1.0 / math.sqrt(fan_in)
    w = jax.random.uniform(kw, (1, fan_in), jnp.float32, -bound, bound)
    b = jax.random.uniform(kb, (1, 1), jnp.float32, -bound, bound)
    params.append((w, b))
    return params


def lambdarank_reference(x, params, sigma=1.0):
    (w1, b1), (w2, b2), (w3, b3) = params
    h = jnp.maximum(x @ w1 + b1, 0.0)
    h = jnp.maximum(h @ w2 + b2, 0.0)
    return jnp.clip(h @ w3.T + b3, 0.0, 6.0) * sigma


if __name__ == "__main__":
    net_structures = [32, 64, 32]   # fc1: 32->64, fc2: 64->32, fc3: 32->1
    sigma = 1.0
    N = 300                         # ragged vs the 128-row min tile (3 tiles)

    key = jax.random.PRNGKey(0)
    key, kx = jax.random.split(key)
    x = jax.random.normal(kx, (N, net_structures[0]), jnp.float32)
    params = init_params(key, net_structures)

    ref = lambdarank_reference(x, params, sigma=sigma)

    # Exact f32 MXU path (multi-tile grid, ragged last tile, no padding pass).
    out_f32 = jax.block_until_ready(
        lambdarank_forward(x, params, sigma=sigma, mxu_dtype=None))
    assert out_f32.shape == (N, 1)
    assert jnp.allclose(out_f32, ref, atol=1e-4, rtol=1e-4), \
        "f32 mismatch vs reference"

    # Default path: f32 HBM streaming, bf16 on the MXU, f32 accumulation.
    out = jax.block_until_ready(lambdarank_forward(x, params, sigma=sigma))
    assert out.shape == (N, 1)
    assert jnp.allclose(out, ref, atol=5e-2, rtol=5e-2), \
        "bf16-MXU mismatch vs f32 reference"

    print("KERNEL_OK")
</pallas_src>

<mosaic_0001>
module attributes {stable_mosaic.version = 11 : i64} {
  func.func @_lambdarank_kernel(%arg0: i32, %arg1: memref<128x32xf32, #tpu.memory_space<vmem>>, %arg2: memref<32x64xf32, #tpu.memory_space<vmem>>, %arg3: memref<1x64xf32, #tpu.memory_space<vmem>>, %arg4: memref<64x32xf32, #tpu.memory_space<vmem>>, %arg5: memref<1x32xf32, #tpu.memory_space<vmem>>, %arg6: memref<1x32xf32, #tpu.memory_space<vmem>>, %arg7: memref<1x1xf32, #tpu.memory_space<vmem>>, %arg8: memref<1x1x128xf32, #tpu.memory_space<vmem>>) attributes {dimension_semantics = [#tpu.dimension_semantics<parallel>], iteration_bounds = array<i64: 3>, scalar_prefetch = 0 : i64, scratch_operands = 0 : i64, tpu.core_type = #tpu.core_type<tc>, window_params = [{transform_indices = @transform_0, window_bounds = array<i64: 128, 32>}, {pipeline_mode = #tpu.pipeline_mode<synchronous>, transform_indices = @transform_1, window_bounds = array<i64: 32, 64>}, {pipeline_mode = #tpu.pipeline_mode<synchronous>, transform_indices = @transform_2, window_bounds = array<i64: 1, 64>}, {pipeline_mode = #tpu.pipeline_mode<synchronous>, transform_indices = @transform_3, window_bounds = array<i64: 64, 32>}, {pipeline_mode = #tpu.pipeline_mode<synchronous>, transform_indices = @transform_4, window_bounds = array<i64: 1, 32>}, {pipeline_mode = #tpu.pipeline_mode<synchronous>, transform_indices = @transform_5, window_bounds = array<i64: 1, 32>}, {pipeline_mode = #tpu.pipeline_mode<synchronous>, transform_indices = @transform_6, window_bounds = array<i64: 1, 1>}, {transform_indices = @transform_7, window_bounds = array<i64: 1, 1, 128>}]} {
    %c0 = arith.constant 0 : index
    %c0_0 = arith.constant 0 : index
    %0 = vector.load %arg1[%c0, %c0_0] : memref<128x32xf32, #tpu.memory_space<vmem>>, vector<128x32xf32>
    %c0_1 = arith.constant 0 : index
    %c0_2 = arith.constant 0 : index
    %1 = vector.load %arg2[%c0_1, %c0_2] : memref<32x64xf32, #tpu.memory_space<vmem>>, vector<32x64xf32>
    %cst = arith.constant dense<0.000000e+00> : vector<128x64xf32>
    %2 = tpu.matmul %0, %1, %cst {dimension_numbers = #tpu.dot_dimension_numbers<[1], [0], [0], [1], [0, 0, 1, 1], [], []>} : vector<128x32xf32>, vector<32x64xf32>, vector<128x64xf32> -> vector<128x64xf32>
    %c0_3 = arith.constant 0 : index
    %c0_4 = arith.constant 0 : index
    %3 = vector.load %arg3[%c0_3, %c0_4] : memref<1x64xf32, #tpu.memory_space<vmem>>, vector<1x64xf32>
    %4 = vector.broadcast %3 : vector<1x64xf32> to vector<128x64xf32>
    %5 = arith.addf %2, %4 : vector<128x64xf32>
    %cst_5 = arith.constant 0.000000e+00 : f32
    %6 = vector.broadcast %cst_5 : f32 to vector<128x64xf32>
    %7 = arith.maximumf %5, %6 : vector<128x64xf32>
    %c0_6 = arith.constant 0 : index
    %c0_7 = arith.constant 0 : index
    %8 = vector.load %arg4[%c0_6, %c0_7] : memref<64x32xf32, #tpu.memory_space<vmem>>, vector<64x32xf32>
    %cst_8 = arith.constant dense<0.000000e+00> : vector<128x32xf32>
    %9 = tpu.matmul %7, %8, %cst_8 {dimension_numbers = #tpu.dot_dimension_numbers<[1], [0], [0], [1], [0, 0, 1, 1], [], []>} : vector<128x64xf32>, vector<64x32xf32>, vector<128x32xf32> -> vector<128x32xf32>
    %c0_9 = arith.constant 0 : index
    %c0_10 = arith.constant 0 : index
    %10 = vector.load %arg5[%c0_9, %c0_10] : memref<1x32xf32, #tpu.memory_space<vmem>>, vector<1x32xf32>
    %11 = vector.broadcast %10 : vector<1x32xf32> to vector<128x32xf32>
    %12 = arith.addf %9, %11 : vector<128x32xf32>
    %cst_11 = arith.constant 0.000000e+00 : f32
    %13 = vector.broadcast %cst_11 : f32 to vector<128x32xf32>
    %14 = arith.maximumf %12, %13 : vector<128x32xf32>
    %c0_12 = arith.constant 0 : index
    %c0_13 = arith.constant 0 : index
    %15 = vector.load %arg6[%c0_12, %c0_13] : memref<1x32xf32, #tpu.memory_space<vmem>>, vector<1x32xf32>
    %cst_14 = arith.constant dense<0.000000e+00> : vector<1x128xf32>
    %16 = tpu.matmul %15, %14, %cst_14 {dimension_numbers = #tpu.dot_dimension_numbers<[1], [1], [0], [0], [0, 0, 1, 0], [], []>} : vector<1x32xf32>, vector<128x32xf32>, vector<1x128xf32> -> vector<1x128xf32>
    %c0_15 = arith.constant 0 : index
    %c0_16 = arith.constant 0 : index
    %17 = vector.load %arg7[%c0_15, %c0_16] : memref<1x1xf32, #tpu.memory_space<vmem>>, vector<1x1xf32>
    %18 = vector.broadcast %17 : vector<1x1xf32> to vector<1x128xf32>
    %19 = arith.addf %16, %18 : vector<1x128xf32>
    %cst_17 = arith.constant 0.000000e+00 : f32
    %cst_18 = arith.constant 6.000000e+00 : f32
    %20 = vector.broadcast %cst_17 : f32 to vector<1x128xf32>
    %21 = arith.maximumf %20, %19 : vector<1x128xf32>
    %22 = vector.broadcast %cst_18 : f32 to vector<1x128xf32>
    %23 = arith.minimumf %22, %21 : vector<1x128xf32>
    %cst_19 = arith.constant 1.000000e+00 : f32
    %24 = vector.broadcast %cst_19 : f32 to vector<1x128xf32>
    %25 = arith.mulf %23, %24 : vector<1x128xf32>
    %c0_20 = arith.constant 0 : index
    %c0_21 = arith.constant 0 : index
    %c0_22 = arith.constant 0 : index
    %26 = vector.load %arg8[%c0_20, %c0_21, %c0_22] : memref<1x1x128xf32, #tpu.memory_space<vmem>>, vector<1x1x128xf32>
    %27 = vector.shape_cast %26 : vector<1x1x128xf32> to vector<1x128xf32>
    %28 = vector.shape_cast %25 : vector<1x128xf32> to vector<1x1x128xf32>
    tpu.vector_store %arg8[%c0_20, %c0_21, %c0_22], %28 {strides = array<i32>} : memref<1x1x128xf32, #tpu.memory_space<vmem>>, vector<1x1x128xf32>,
    return
  }
  func.func @transform_0(%arg0: i32) -> (i32, i32) {
    %c0_i32 = arith.constant 0 : i32
    %c0_i32_0 = arith.constant 0 : i32
    return %arg0, %c0_i32 : i32, i32
  }
  func.func @transform_1(%arg0: i32) -> (i32, i32) {
    %c0_i32 = arith.constant 0 : i32
    %c0_i32_0 = arith.constant 0 : i32
    %c0_i32_1 = arith.constant 0 : i32
    return %c0_i32, %c0_i32_0 : i32, i32
  }
  func.func @transform_2(%arg0: i32) -> (i32, i32) {
    %c0_i32 = arith.constant 0 : i32
    %c0_i32_0 = arith.constant 0 : i32
    %c0_i32_1 = arith.constant 0 : i32
    return %c0_i32, %c0_i32_0 : i32, i32
  }
  func.func @transform_3(%arg0: i32) -> (i32, i32) {
    %c0_i32 = arith.constant 0 : i32
    %c0_i32_0 = arith.constant 0 : i32
    %c0_i32_1 = arith.constant 0 : i32
    return %c0_i32, %c0_i32_0 : i32, i32
  }
  func.func @transform_4(%arg0: i32) -> (i32, i32) {
    %c0_i32 = arith.constant 0 : i32
    %c0_i32_0 = arith.constant 0 : i32
    %c0_i32_1 = arith.constant 0 : i32
    return %c0_i32, %c0_i32_0 : i32, i32
  }
  func.func @transform_5(%arg0: i32) -> (i32, i32) {
    %c0_i32 = arith.constant 0 : i32
    %c0_i32_0 = arith.constant 0 : i32
    %c0_i32_1 = arith.constant 0 : i32
    return %c0_i32, %c0_i32_0 : i32, i32
  }
  func.func @transform_6(%arg0: i32) -> (i32, i32) {
    %c0_i32 = arith.constant 0 : i32
    %c0_i32_0 = arith.constant 0 : i32
    %c0_i32_1 = arith.constant 0 : i32
    return %c0_i32, %c0_i32_0 : i32, i32
  }
  func.func @transform_7(%arg0: i32) -> (i32, i32, i32) {
    %c0_i32 = arith.constant 0 : i32
    %c0_i32_0 = arith.constant 0 : i32
    %c0_i32_1 = arith.constant 0 : i32
    return %arg0, %c0_i32, %c0_i32_0 : i32, i32, i32
  }
}

</mosaic_0001>

<bundles_post_ra>
// kernel: tpu_custom_call.1
= control target key start
LH: loop header
LB: loop body
LE: loop exit
PB: predicated region body
PF: predicated region fallthrough
CT: control target
= control target key end

     0   :  { %s1183_s0 = inlined_call_operand.vmem [shape: f32[300,32], index: 0, kind: input, shape index: {}]   ;;  %s1184_s1 = inlined_call_operand.vmem [shape: f32[32,64], index: 1, kind: input, shape index: {}]   ;;  %s1185_s2 = inlined_call_operand.vmem [shape: f32[1,64], index: 2, kind: input, shape index: {}]   ;;  %s1186_s3 = inlined_call_operand.vmem [shape: f32[64,32], index: 3, kind: input, shape index: {}]   ;;  %s1187_s4 = inlined_call_operand.vmem [shape: f32[1,32], index: 4, kind: input, shape index: {}]   ;;  %s1188_s5 = inlined_call_operand.vmem [shape: f32[1,32], index: 5, kind: input, shape index: {}]   ;;  %s1189_s6 = inlined_call_operand.<no memory space> [shape: f32[1,1], index: 6, kind: input, shape index: {}]   ;;  %s1190_s7 = inlined_call_operand.hbm [shape: f32[3,1,128], index: 7, kind: output, shape index: {}]  }
   0x1   :  { %v12_v0 = vstv %s1189_s6 }
   0x2   :  { %13 = vst [vmem:[#allocation2] sm:$0x1] %v12_v0 }
   0x3   :  { %14 = vsyncpa [#allocation4], 0 }
   0x4   :  { %16 = vsyncpa [#allocation4 + $0x1], 0  ;;  %s966_s26 = smov 0   ;;  %s968_s27 = smov 0  }
   0x5   :  { %s970_s28 = smov 0   ;;  %s972_s29 = smov 0  }
   0x6 LB: > { %s987_s6 = sadd.s32 4294967295, %s920_s29   ;;  %s746_s30 = sadd.s32 4294967294, %s920_s29   ;;  %s920_s29 = sphi %s972_s29, %s1196_s29   ;;  %s916_s28 = sphi %s970_s28, %s1195_s28   ;;  %s912_s27 = sphi %s968_s27, %s1194_s27   ;;  %s908_s26 = sphi %s966_s26, %s1193_s26  }
   0x7   : > { %s991_s8 = sadd.s32 1, %s920_s29   ;;  %s181_s9 = sadd.s32 1, %s916_s28 }
   0x8   : > { %s178_s10 = ssub.s32 %s920_s29, %s991_s8  ;;  %p191_p0 = scmp.ne.s32.totalorder %s916_s28, %s912_s27 }
   0x9   : > { %p179_p1 = scmp.eq.s32.totalorder %s178_s10, 0  ;;  %p192_p2 = scmp.eq.s32.totalorder %s987_s6, 2 }
   0xa   : > { %p197_p3 = scmp.ne.s32.totalorder %s912_s27, %s908_s26  ;;  %p198_p4 = scmp.eq.s32.totalorder %s746_s30, 2 }
   0xb   : > { %s1002_s11 = scalar_select %p179_p1, %s916_s28, %s181_s9  }
   0xc   : > { %p1004_p5 = por %p192_p2, %p191_p0  ;;  %p1008_p6 = por %p198_p4, %p197_p3 }
   0xd   : > { %p749_p7 = scmp.ge.s32.totalorder %s920_s29, 1  ;;  %p251_p8 = scmp.lt.s32.totalorder %s920_s29, 4 }
   0xf   : > { %p252_p9 = pnand %p749_p7, %p251_p8 }
  0x10   : > { %s750_s18 = sshll.u32 (!%p252_p9), %s987_s6, 4  ;;  %s284_s19 = sand.u32 (!%p252_p9), 1, %s912_s27  }
  0x11   : > { %255 = sbr.rel (%p252_p9) target bundleno = 620 (0x26c), region = 48  ;;  %p291_p10 = scmp.lt.s32.totalorder (!%p252_p9), %s750_s18, 37 }
  0x12   : > { %s687_s22 = scalar_lea.hbm (!%p252_p9), %s1190_s7, %s987_s6  ;;  %s679_s9 = scalar_lea.sflag (!%p252_p9), [#allocation4], %s284_s19 }
  0x13   : > { %s691_s25 = sshll.u32 (!%p252_p9), %s687_s22, 4  ;;  %s878_s15 = scalar_lea.hbm (!%p252_p9), %s1190_s7, 3  ;;  %s692_s25 = int_to_ptr.hbm [resolvable:$true] %s691_s25 }
  0x14   : > { %s872_s10 = sshra.s32 (!%p252_p9), %s692_s25, 4  ;;  %s873_s10 = int_to_ptr.hbm [resolvable:$true] %s872_s10 }
  0x15   : > { %p879_p0 = scmp.lt.s32.totalorder (!%p252_p9), %s873_s10, %s1190_s7 }
  0x16   : > { %v319_v1 = vld [vmem:[%s1184_s1 + $0x18] sm:$0xff]  ;;  %v318_v2 = vld [vmem:[%s1184_s1 + $0x10] sm:$0xff]  ;;  %v317_v3 = vld [vmem:[%s1184_s1 + $0x8] sm:$0xff]  ;;  %s1198_s18 = smov (!%p291_p10, %s750_s18), 37  ;;  %vm324_vm0 = vcmask 261120   ;;  %vm466_vm1 = vcmask 523264  }
  0x17   : > { %385 = vmatpush.msra.mxu0 %v319_v1  ;;  %803 = vmatpush.msra.mxu3 %v319_v1  ;;  %v316_v4 = vld [vmem:[%s1184_s1] sm:$0xff]  ;;  %s751_s23 = sshll.u32 %s1198_s18, 3  ;;  %v461_v13 = vld [vmem:[%s1186_s3 + $0x38] sm:$0xff]  ;;  %v460_v14 = vld [vmem:[%s1186_s3 + $0x30] sm:$0xff] }
  0x18   : > { %s1030_s30 = scalar_lea.vmem %s1183_s0, %s751_s23  ;;  %523 = vmatpush.msra.mxu1 %v461_v13  ;;  %v459_v15 = vld [vmem:[%s1186_s3 + $0x28] sm:$0xff]  ;;  %v458_v17 = vld [vmem:[%s1186_s3 + $0x20] sm:$0xff]  ;;  %v457_v19 = vld [vmem:[%s1186_s3 + $0x18] sm:$0xff]  ;;  %s285_s23 = scalar_lea.vmem [#allocation3], %s284_s19 }
  0x19   : > { %386 = vmatpush.msra.mxu0 %v318_v2  ;;  %804 = vmatpush.msra.mxu3 %v318_v2  ;;  %v300_v5 = vld [vmem:[%s1030_s30] sm:$0xff]  ;;  %v301_v6 = vld [vmem:[%s1030_s30 + $0x8] sm:$0xff]  ;;  %v302_v7 = vld [vmem:[%s1030_s30 + $0x10] sm:$0xff]  ;;  %s689_s24 = sshll.u32 %s285_s23, 4  ;;  %s690_s24 = int_to_ptr.vmem [resolvable:$true] %s689_s24 }
  0x1a   : > { %v303_v8 = vld [vmem:[%s1030_s30 + $0x18] sm:$0xff]  ;;  %v304_v9 = vld [vmem:[%s1030_s30 + $0x20] sm:$0xff]  ;;  %v305_v10 = vld [vmem:[%s1030_s30 + $0x28] sm:$0xff]  ;;  %524 = vmatpush.msra.mxu1 %v460_v14 }
  0x1b   : > { %387 = vmatpush.msra.mxu0 %v317_v3  ;;  %805 = vmatpush.msra.mxu3 %v317_v3  ;;  %v306_v11 = vld [vmem:[%s1030_s30 + $0x30] sm:$0xff]  ;;  %v311_v12 = vld [vmem:[%s1030_s30 + $0x58] sm:$0xff]  ;;  %v312_v18 = vld [vmem:[%s1030_s30 + $0x60] sm:$0xff] }
  0x1c   : > { %v307_v16 = vld [vmem:[%s1030_s30 + $0x38] sm:$0xff]  ;;  %525 = vmatpush.msra.mxu1 %v459_v15  ;;  %v308_v20 = vld [vmem:[%s1030_s30 + $0x40] sm:$0xff]  ;;  %v313_v21 = vld [vmem:[%s1030_s30 + $0x68] sm:$0xff] }
  0x1d   : > { %388 = vmatpush.msra.mxu0 %v316_v4  ;;  %806 = vmatpush.msra.mxu3 %v316_v4  ;;  %v309_v22 = vld [vmem:[%s1030_s30 + $0x48] sm:$0xff]  ;;  %v314_v23 = vld [vmem:[%s1030_s30 + $0x70] sm:$0xff]  ;;  %v315_v25 = vld [vmem:[%s1030_s30 + $0x78] sm:$0xff] }
  0x1e   : > { %752 = vmatmul.msk.f32.vlgmr.msra.gmra.mxu0 %vm324_vm0, %v300_v5  ;;  %763 = vmatmul.msk.f32.vlgmr.msra.gmra.mxu3 %vm324_vm0, %v311_v12  ;;  %v310_v24 = vld [vmem:[%s1030_s30 + $0x50] sm:$0xff]  ;;  %v455_v27 = vld [vmem:[%s1186_s3 + $0x8] sm:$0xff]  ;;  %v454_v28 = vld [vmem:[%s1186_s3] sm:$0xff]  ;;  %s874_s30 = scalar_lea.hbm %s873_s10, 1 }
  0x1f   : > { %807 = vmatpush.msrb.mxu3 %v461_v13  ;;  %526 = vmatpush.msra.mxu1 %v458_v17  ;;  %v456_v26 = vld [vmem:[%s1186_s3 + $0x10] sm:$0xff]  ;;  %v1091_v29 = vld [vmem:[%s1185_s2] ss:$0 sm:$0xff]  ;;  %p875_p11 = scmp.ne.s32.totalorder %s873_s10, %s874_s30  ;;  %p880_p1 = scmp.lt.s32.totalorder %s878_s15, %s874_s30 }
  0x21   : > { %808 = vmatpush.msrb.mxu3 %v460_v14  ;;  %527 = vmatpush.msra.mxu1 %v457_v19  ;;  %p876_p12 = pnand %p875_p11, %p1004_p5  ;;  %p881_p2 = por %p880_p1, %p879_p0 }
  0x23   : > { %809 = vmatpush.msrb.mxu3 %v459_v15  ;;  %528 = vmatpush.msra.mxu1 %v456_v26  ;;  %p877_p13 = pneg %p876_p12 }
  0x25   : > { %810 = vmatpush.msrb.mxu3 %v458_v17  ;;  %529 = vmatpush.msra.mxu1 %v455_v27  ;;  %p882_p3 = pnand %p881_p2, %p877_p13 }
  0x26   : > { %753 = vmatmul.msk.f32.gmra.mxu0 %vm324_vm0, %v301_v6  ;;  %764 = vmatmul.msk.f32.gmra.mxu3 %vm324_vm0, %v312_v18 }
  0x27   : > { %811 = vmatpush.msrb.mxu3 %v457_v19  ;;  %530 = vmatpush.msra.mxu1 %v454_v28 }
  0x29   : > { %812 = vmatpush.msrb.mxu3 %v456_v26  ;;  %v857_v26 = vld [vmem:[%s1187_s4] ss:$0 sm:$0xff] }
  0x2b   : > { %813 = vmatpush.msrb.mxu3 %v455_v27 }
  0x2d   : > { %814 = vmatpush.msrb.mxu3 %v454_v28 }
  0x2e   : > { %754 = vmatmul.msk.f32.gmra.mxu0 %vm324_vm0, %v302_v7  ;;  %765 = vmatmul.msk.f32.gmra.mxu3 %vm324_vm0, %v313_v21 }
  0x36   : > { %755 = vmatmul.msk.f32.gmra.mxu0 %vm324_vm0, %v303_v8  ;;  %766 = vmatmul.msk.f32.gmra.mxu3 %vm324_vm0, %v314_v23 }
  0x3e   : > { %756 = vmatmul.msk.f32.gmra.mxu0 %vm324_vm0, %v304_v9  ;;  %767 = vmatmul.msk.f32.gmra.mxu3 %vm324_vm0, %v315_v25 }
  0x46   : > { %757 = vmatmul.msk.f32.gmra.mxu0 %vm324_vm0, %v305_v10 }
  0x4e   : > { %758 = vmatmul.msk.f32.gmra.mxu0 %vm324_vm0, %v306_v11 }
  0x56   : > { %759 = vmatmul.msk.f32.gmra.mxu0 %vm324_vm0, %v307_v16 }
  0x5e   : > { %760 = vmatmul.msk.f32.gmra.mxu0 %vm324_vm0, %v308_v20 }
  0x66   : > { %761 = vmatmul.msk.f32.gmra.mxu0 %vm324_vm0, %v309_v22 }
  0x6e   : > { %762 = vmatmul.msk.f32.gmra.mxu0 %vm324_vm0, %v310_v24 }
  0x9b   : > { %v390_v30 = vpop.f32.mrf.mxu0 }
  0x9c   : > { %v391_v31 = vadd.f32 %v1091_v29, %v390_v30 }
  0x9e   : > { %v438_v32 = vmax.f32 %v391_v31, 0.0 }
  0xa0   : > { %768 = vmatmul.msk.f32.vlgmr.msra.gmra.mxu1 %vm466_vm1, %v438_v32 }
  0xa1   : > { %v423_v59 = vpop.f32.mrf.mxu3 }
  0xa2   : > { %v424_v1 = vadd.f32 %v1091_v29, %v423_v59 }
  0xa3   : > { %v393_v33 = vpop.f32.mrf.mxu0 }
  0xa4   : > { %v394_v34 = vadd.f32 %v1091_v29, %v393_v33  ;;  %v449_v2 = vmax.f32 %v424_v1, 0.0  ;;  %v596_v1 = vld [vmem:[%s1188_s5] sm:$0x1] }
  0xa6   : > { %v439_v35 = vmax.f32 %v394_v34, 0.0 }
  0xa8   : > { %769 = vmatmul.msk.f32.gmra.mxu1 %vm466_vm1, %v439_v35 }
  0xa9   : > { %v426_v0 = vpop.f32.mrf.mxu3 }
  0xaa   : > { %v427_v3 = vadd.f32 %v1091_v29, %v426_v0 }
  0xab   : > { %v396_v36 = vpop.f32.mrf.mxu0 }
  0xac   : > { %v397_v37 = vadd.f32 %v1091_v29, %v396_v36  ;;  %v450_v5 = vmax.f32 %v427_v3, 0.0 }
  0xae   : > { %v440_v38 = vmax.f32 %v397_v37, 0.0 }
  0xb0   : > { %770 = vmatmul.msk.f32.gmra.mxu1 %vm466_vm1, %v440_v38 }
  0xb1   : > { %v429_v4 = vpop.f32.mrf.mxu3 }
  0xb2   : > { %v430_v6 = vadd.f32 %v1091_v29, %v429_v4 }
  0xb3   : > { %v399_v39 = vpop.f32.mrf.mxu0 }
  0xb4   : > { %v400_v40 = vadd.f32 %v1091_v29, %v399_v39  ;;  %v451_v8 = vmax.f32 %v430_v6, 0.0 }
  0xb6   : > { %v441_v41 = vmax.f32 %v400_v40, 0.0 }
  0xb8   : > { %771 = vmatmul.msk.f32.gmra.mxu1 %vm466_vm1, %v441_v41 }
  0xb9   : > { %v432_v7 = vpop.f32.mrf.mxu3 }
  0xba   : > { %v433_v9 = vadd.f32 %v1091_v29, %v432_v7 }
  0xbb   : > { %v402_v42 = vpop.f32.mrf.mxu0 }
  0xbc   : > { %v403_v43 = vadd.f32 %v1091_v29, %v402_v42  ;;  %v452_v10 = vmax.f32 %v433_v9, 0.0 }
  0xbe   : > { %v442_v44 = vmax.f32 %v403_v43, 0.0 }
  0xc0   : > { %772 = vmatmul.msk.f32.gmra.mxu1 %vm466_vm1, %v442_v44 }
  0xc1   : > { %v435_v11 = vpop.f32.mrf.mxu3 }
  0xc2   : > { %v436_v12 = vadd.f32 %v1091_v29, %v435_v11 }
  0xc3   : > { %v405_v45 = vpop.f32.mrf.mxu0 }
  0xc4   : > { %v406_v46 = vadd.f32 %v1091_v29, %v405_v45  ;;  %v453_v13 = vmax.f32 %v436_v12, 0.0 }
  0xc6   : > { %v443_v47 = vmax.f32 %v406_v46, 0.0 }
  0xc8   : > { %773 = vmatmul.msk.f32.gmra.mxu1 %vm466_vm1, %v443_v47 }
  0xcb   : > { %v408_v48 = vpop.f32.mrf.mxu0 }
  0xcc   : > { %v409_v49 = vadd.f32 %v1091_v29, %v408_v48 }
  0xce   : > { %v444_v50 = vmax.f32 %v409_v49, 0.0 }
  0xd0   : > { %774 = vmatmul.msk.f32.gmra.mxu1 %vm466_vm1, %v444_v50  ;;  %v597_v50 = vld [vmem:[#allocation2] sm:$0x1] }
  0xd3   : > { %v411_v51 = vpop.f32.mrf.mxu0 }
  0xd4   : > { %v412_v52 = vadd.f32 %v1091_v29, %v411_v51  ;;  %v922_v51 = vmov 0  }
  0xd5   : > { %855 = vset.pattern.permute.xlu0 %v922_v51 }
  0xd6   : > { %v445_v53 = vmax.f32 %v412_v52, 0.0  ;;  %600 = vperm.xlu0 %855, %v597_v50  }
  0xd8   : > { %775 = vmatmul.msk.f32.gmra.mxu1 %vm466_vm1, %v445_v53 }
  0xdb   : > { %v414_v54 = vpop.f32.mrf.mxu0 }
  0xdc   : > { %v415_v55 = vadd.f32 %v1091_v29, %v414_v54 }
  0xde   : > { %v446_v56 = vmax.f32 %v415_v55, 0.0 }
  0xe0   : > { %776 = vmatmul.msk.f32.gmra.mxu1 %vm466_vm1, %v446_v56 }
  0xe3   : > { %v417_v57 = vpop.f32.mrf.mxu0 }
  0xe4   : > { %v418_v58 = vadd.f32 %v1091_v29, %v417_v57 }
  0xe6   : > { %v447_v60 = vmax.f32 %v418_v58, 0.0 }
  0xe8   : > { %777 = vmatmul.msk.f32.gmra.mxu1 %vm466_vm1, %v447_v60 }
  0xeb   : > { %v420_v61 = vpop.f32.mrf.mxu0 }
  0xec   : > { %v421_v62 = vadd.f32 %v1091_v29, %v420_v61 }
  0xee   : > { %v448_v63 = vmax.f32 %v421_v62, 0.0 }
  0xf0   : > { %778 = vmatmul.msk.f32.vlgmr.msrb.gmra.mxu3 %vm466_vm1, %v448_v63 }
  0xf8   : > { %779 = vmatmul.msk.f32.gmra.mxu3 %vm466_vm1, %v449_v2 }
 0x100   : > { %780 = vmatmul.msk.f32.gmra.mxu3 %vm466_vm1, %v450_v5 }
 0x108   : > { %781 = vmatmul.msk.f32.gmra.mxu3 %vm466_vm1, %v451_v8 }
 0x110   : > { %782 = vmatmul.msk.f32.gmra.mxu3 %vm466_vm1, %v452_v10 }
 0x118   : > { %783 = vmatmul.msk.f32.gmra.mxu3 %vm466_vm1, %v453_v13 }
 0x11d   : > { %v1125_v14 = vpop.f32.mrf.mxu1 }
 0x11e   : > { %v533_v62 = vadd.f32 %v857_v26, %v1125_v14 }
 0x120   : > { %v580_v0 = vmax.f32 %v533_v62, 0.0 }
 0x125   : > { %v535_v15 = vpop.f32.mrf.mxu1 }
 0x126   : > { %v536_v60 = vadd.f32 %v857_v26, %v535_v15 }
 0x128   : > { %v581_v63 = vmax.f32 %v536_v60, 0.0 }
 0x12d   : > { %v538_v16 = vpop.f32.mrf.mxu1 }
 0x12e   : > { %v539_v58 = vadd.f32 %v857_v26, %v538_v16 }
 0x130   : > { %v582_v61 = vmax.f32 %v539_v58, 0.0 }
 0x135   : > { %v541_v17 = vpop.f32.mrf.mxu1 }
 0x136   : > { %v542_v56 = vadd.f32 %v857_v26, %v541_v17 }
 0x138   : > { %v583_v59 = vmax.f32 %v542_v56, 0.0 }
 0x13d   : > { %v544_v20 = vpop.f32.mrf.mxu1 }
 0x13e   : > { %v545_v54 = vadd.f32 %v857_v26, %v544_v20 }
 0x140   : > { %v584_v57 = vmax.f32 %v545_v54, 0.0 }
 0x145   : > { %v547_v22 = vpop.f32.mrf.mxu1 }
 0x146   : > { %v548_v52 = vadd.f32 %v857_v26, %v547_v22 }
 0x148   : > { %v585_v55 = vmax.f32 %v548_v52, 0.0  ;;  %v601_v2 = vpop.permute.xlu0 %600 }
 0x149   : > { %v603_v3 = vperm.slane %v601_v2, 0 }
 0x14d   : > { %v550_v24 = vpop.f32.mrf.mxu1 }
 0x14e   : > { %v551_v48 = vadd.f32 %v857_v26, %v550_v24 }
 0x150   : > { %v586_v53 = vmax.f32 %v551_v48, 0.0 }
 0x155   : > { %v553_v27 = vpop.f32.mrf.mxu1 }
 0x156   : > { %v554_v46 = vadd.f32 %v857_v26, %v553_v27 }
 0x158   : > { %v587_v49 = vmax.f32 %v554_v46, 0.0 }
 0x15d   : > { %v556_v34 = vpop.f32.mrf.mxu1 }
 0x15e   : > { %v557_v44 = vadd.f32 %v857_v26, %v556_v34 }
 0x160   : > { %v588_v47 = vmax.f32 %v557_v44, 0.0 }
 0x165   : > { %v559_v41 = vpop.f32.mrf.mxu1 }
 0x166   : > { %v560_v42 = vadd.f32 %v857_v26, %v559_v41 }
 0x168   : > { %v589_v45 = vmax.f32 %v560_v42, 0.0 }
 0x173   : > { %v562_v18 = vpop.f32.mrf.mxu3 }
 0x174   : > { %v563_v39 = vadd.f32 %v857_v26, %v562_v18 }
 0x176   : > { %v590_v43 = vmax.f32 %v563_v39, 0.0 }
 0x17b   : > { %v565_v19 = vpop.f32.mrf.mxu3 }
 0x17c   : > { %v566_v37 = vadd.f32 %v857_v26, %v565_v19 }
 0x17e   : > { %v591_v40 = vmax.f32 %v566_v37, 0.0 }
 0x183   : > { %v568_v21 = vpop.f32.mrf.mxu3 }
 0x184   : > { %v569_v35 = vadd.f32 %v857_v26, %v568_v21 }
 0x186   : > { %v592_v38 = vmax.f32 %v569_v35, 0.0 }
 0x18b   : > { %v571_v23 = vpop.f32.mrf.mxu3 }
 0x18c   : > { %v572_v32 = vadd.f32 %v857_v26, %v571_v23 }
 0x18e   : > { %v593_v36 = vmax.f32 %v572_v32, 0.0 }
 0x193   : > { %v574_v25 = vpop.f32.mrf.mxu3 }
 0x194   : > { %v575_v30 = vadd.f32 %v857_v26, %v574_v25 }
 0x196   : > { %v594_v33 = vmax.f32 %v575_v30, 0.0 }
 0x19b   : > { %v577_v28 = vpop.f32.mrf.mxu3 }
 0x19c   : > { %v578_v29 = vadd.f32 %v857_v26, %v577_v28 }
 0x19e   : > { %v595_v31 = vmax.f32 %v578_v29, 0.0 }
 0x1a0   : > { %784 = vmatpush.xpose.msk.msra.mxu2 %vm324_vm0, %v595_v31 }
 0x1a4   : > { %785 = vmatpush.xpose.msk.msra.mxu2 %vm324_vm0, %v594_v33 }
 0x1a8   : > { %786 = vmatpush.xpose.msk.msra.mxu2 %vm324_vm0, %v593_v36 }
 0x1ac   : > { %787 = vmatpush.xpose.msk.msra.mxu2 %vm324_vm0, %v592_v38 }
 0x1b0   : > { %788 = vmatpush.xpose.msk.msra.mxu2 %vm324_vm0, %v591_v40 }
 0x1b4   : > { %789 = vmatpush.xpose.msk.msra.mxu2 %vm324_vm0, %v590_v43 }
 0x1b8   : > { %790 = vmatpush.xpose.msk.msra.mxu2 %vm324_vm0, %v589_v45 }
 0x1bc   : > { %791 = vmatpush.xpose.msk.msra.mxu2 %vm324_vm0, %v588_v47 }
 0x1c0   : > { %792 = vmatpush.xpose.msk.msra.mxu2 %vm324_vm0, %v587_v49 }
 0x1c4   : > { %793 = vmatpush.xpose.msk.msra.mxu2 %vm324_vm0, %v586_v53 }
 0x1c8   : > { %794 = vmatpush.xpose.msk.msra.mxu2 %vm324_vm0, %v585_v55 }
 0x1cc   : > { %795 = vmatpush.xpose.msk.msra.mxu2 %vm324_vm0, %v584_v57 }
 0x1d0   : > { %796 = vmatpush.xpose.msk.msra.mxu2 %vm324_vm0, %v583_v59 }
 0x1d4   : > { %797 = vmatpush.xpose.msk.msra.mxu2 %vm324_vm0, %v582_v61 }
 0x1d8   : > { %798 = vmatpush.xpose.msk.msra.mxu2 %vm324_vm0, %v581_v63 }
 0x1dc   : > { %799 = vmatpush.xpose.msk.msra.mxu2 %vm324_vm0, %v580_v0 }
 0x1df   : > { %800 = vmatmul.msk.f32.vlgmr.msra.gmra.mxu2 %vm324_vm0, %v596_v1 }
 0x262   : > { %v672_v4 = vpop.f32.mrf.mxu2 }
 0x263   : > { %v673_v5 = vadd.f32 %v672_v4, %v603_v3 }
 0x265   : > { %v675_v6 = vmax.f32 %v673_v5, 0.0 }
 0x267   : > { %v676_v7 = vmin.f32 %v675_v6, 6.0 }
 0x269   : > { %677 = vst [vmem:[%s285_s23] sm:$0x1] %v676_v7 }
 0x26a   : > { %885 = shalt.err (!%p882_p3)
}
 0x26b   : > { %815 = dma.vmem_to_hbm [thread:$0]  (%p1004_p5), %s690_s24, 16, %s692_s25, %s679_s9  }
 0x26c PF: > { %p821_p4 = scmp.ge.s32.totalorder %s920_s29, 2  ;;  %s703_s18 = sand.u32 1, %s908_s26  }
 0x26d   : > { %s704_s19 = scalar_lea.sflag [#allocation4], %s703_s18 }
 0x26e   : > { %p818_p7 = pnand %p821_p4, %p1008_p6 }
 0x270   : > { %p819_p8 = pneg %p818_p7 }
 0x272   : > { %903 = dma.done.wait (%p819_p8), %s704_s19, 16  }
 0x273   : > { %905 = vsyncadd (%p819_p8), %s704_s19, 4294967280  ;;  %p19_p9 = scmp.ge.s32.totalorder %s991_s8, 5   ;;  %s1193_s26 = smov %s912_s27 }
 0x274   : > { %s1194_s27 = smov %s916_s28  ;;  %s1195_s28 = smov %s1002_s11 }
 0x275   : > { %s1196_s29 = smov %s991_s8  ;;  %21 = sbr.rel (!%p19_p9) target bundleno = 6 (0x6), region = 83 }
 0x27a   :  { %709 = vsyncpa [#allocation4], 1 }
 0x27b   :  { %711 = vsyncpa [#allocation4 + $0x1], 1 }

</bundles_post_ra>
